<compile_context>
chip_gen: v7x
topology: tpu7x:2x2x1
jax: 0.10.0
libtpu: 0.0.40
codegen_flags: <defaults>
</compile_context>

<pallas_src>
from functools import partial

import numpy as np
import jax
import jax.numpy as jnp
from jax import lax
from jax.experimental import pallas as pl
from jax.experimental.pallas import tpu as pltpu

LANE = 128
_TILE_CANDIDATES = (2048, 1024, 512, 256, 128)


def _round_up(x, m):
    return ((x + m - 1) // m) * m


def _physical_vmem_bytes():
    """Trace-time query of per-core VMEM; conservative 64 MiB fallback (v7x)."""
    try:
        info = pltpu.get_tpu_info()
        for attr in ("vmem_capacity_bytes", "vmem_size_bytes", "vmem_bytes"):
            v = getattr(info, attr, None)
            if v:
                return int(v)
    except Exception:
        pass
    return 64 * 1024 * 1024


def _vmem_budget():
    phys = _physical_vmem_bytes()
    # Leave headroom for double-buffering bookkeeping / compiler scratch.
    return max(32 * 1024 * 1024, int(min(phys * 0.7, 100 * 1024 * 1024)))


def _pick_tile(dim, cap):
    """Largest MXU-friendly tile <= cap that divides a 128-multiple dim."""
    for c in _TILE_CANDIDATES:
        if c <= cap and dim % c == 0:
            return c
    return LANE


def _mm_vmem_estimate(tm, tk, Kd, F, out_itemsize, resident_b):
    a_bytes = 2 * tm * tk * 2                       # double-buffered bf16 A tile
    b_bytes = (2 * Kd * F * 2) if resident_b else (2 * tk * F * 2)
    o_bytes = 2 * tm * F * out_itemsize
    acc_bytes = tm * F * 4
    bias_bytes = 2 * 8 * F * 4
    return a_bytes + b_bytes + o_bytes + acc_bytes + bias_bytes


# --------------------------------------------------------------------------
# Tiled matmul kernel: out = A @ B (+ bias).  Rows "parallel", reduction
# "arbitrary" (last), f32 VMEM accumulator, optionally VMEM-resident B.
# --------------------------------------------------------------------------
def _mm_kernel(*refs, tk, add_bias, resident_b):
    if add_bias:
        a_ref, b_ref, bias_ref, o_ref, acc_ref = refs
    else:
        a_ref, b_ref, o_ref, acc_ref = refs
        bias_ref = None

    k = pl.program_id(1)

    @pl.when(k == 0)
    def _init():
        acc_ref[...] = jnp.zeros_like(acc_ref)

    if resident_b:
        off = pl.multiple_of(k * tk, tk)
        b_blk = b_ref[pl.ds(off, tk), :]
    else:
        b_blk = b_ref[...]

    acc_ref[...] += jnp.dot(a_ref[...], b_blk,
                            preferred_element_type=jnp.float32)

    @pl.when(k == pl.num_programs(1) - 1)
    def _finalize():
        out = acc_ref[...]
        if add_bias:
            out = out + bias_ref[...]
        o_ref[...] = out.astype(o_ref.dtype)


def _tiled_matmul(a, b, bias2d, *, add_bias, out_dtype, budget):
    """out = a @ b (+ bias2d); a: [M, Kd] bf16, b: [Kd, F] bf16 (lane-dense)."""
    M, Kd = a.shape
    Kd2, F = b.shape
    assert Kd == Kd2
    out_itemsize = np.dtype(out_dtype).itemsize

    # Row tile: keep >=2 tiles when possible so megacore can shard rows (v7x).
    tm_cap = max(LANE, min(1024, M // 2)) if M >= 2 * LANE else M
    tm = _pick_tile(M, tm_cap)

    # Keep the narrow B operand fully VMEM-resident when it is cheap enough.
    resident_b = (2 * Kd * F * 2) <= budget // 2

    tk = LANE
    for c in _TILE_CANDIDATES:
        if Kd % c == 0 and _mm_vmem_estimate(tm, c, Kd, F, out_itemsize,
                                             resident_b) <= budget:
            tk = c
            break

    grid = (M // tm, Kd // tk)

    in_specs = [pl.BlockSpec((tm, tk), lambda i, k: (i, k))]   # A row/k tile
    args = [a]
    if resident_b:
        in_specs.append(pl.BlockSpec((Kd, F), lambda i, k: (0, 0)))  # resident B
    else:
        in_specs.append(pl.BlockSpec((tk, F), lambda i, k: (k, 0)))  # streamed B
    args.append(b)
    if add_bias:
        in_specs.append(pl.BlockSpec((1, F), lambda i, k: (0, 0)))
        args.append(bias2d)

    flops = 2 * M * Kd * F
    b_reads = 1 if resident_b else (M // tm)
    bytes_accessed = (a.size * a.dtype.itemsize
                      + b.size * b.dtype.itemsize * b_reads
                      + (bias2d.size * bias2d.dtype.itemsize if add_bias else 0)
                      + M * F * out_itemsize)

    return pl.pallas_call(
        partial(_mm_kernel, tk=tk, add_bias=add_bias, resident_b=resident_b),
        out_shape=jax.ShapeDtypeStruct((M, F), out_dtype),
        grid_spec=pltpu.PrefetchScalarGridSpec(
            num_scalar_prefetch=0,
            grid=grid,
            in_specs=in_specs,
            out_specs=pl.BlockSpec((tm, F), lambda i, k: (i, 0)),
            scratch_shapes=[pltpu.VMEM((tm, F), jnp.float32)],
        ),
        compiler_params=pltpu.CompilerParams(
            dimension_semantics=("parallel", "arbitrary"),
            vmem_limit_bytes=budget,
        ),
        cost_estimate=pl.CostEstimate(
            flops=flops, transcendentals=0, bytes_accessed=bytes_accessed),
    )(*args)


# --------------------------------------------------------------------------
# Fused multi-hop kernel: A_hat resident in VMEM, all K hops in one call.
# h is kept f32 in VMEM; only the MXU operand is cast to bf16 per hop.
# --------------------------------------------------------------------------
def _fused_hops_kernel(a_ref, h_ref, bias_ref, o_ref, *, hops):
    h = h_ref[...].astype(jnp.float32)
    for _ in range(hops):
        h = jnp.dot(a_ref[...], h.astype(jnp.bfloat16),
                    preferred_element_type=jnp.float32)
    o_ref[...] = (h + bias_ref[...]).astype(o_ref.dtype)


def _fused_hops_feasible(M, F, budget):
    # Conservative: count A twice (default double-buffering of the input block).
    a_bytes = 2 * M * M * 2
    h_bytes = 2 * M * F * 2
    work_bytes = 3 * M * F * 4
    out_bytes = 2 * M * F * 4
    bias_bytes = 2 * 8 * F * 4
    return (a_bytes + h_bytes + work_bytes + out_bytes + bias_bytes) <= budget


def _fused_hops(A_pad, h0, bias2d, hops, budget):
    M = A_pad.shape[0]
    F = h0.shape[1]
    flops = 2 * M * M * F * hops
    bytes_accessed = (A_pad.size * 2 + h0.size * h0.dtype.itemsize
                      + bias2d.size * 4 + M * F * 4)
    return pl.pallas_call(
        partial(_fused_hops_kernel, hops=hops),
        out_shape=jax.ShapeDtypeStruct((M, F), jnp.float32),
        grid_spec=pltpu.PrefetchScalarGridSpec(
            num_scalar_prefetch=0,
            grid=(1,),
            in_specs=[pl.BlockSpec((M, M), lambda i: (0, 0)),
                      pl.BlockSpec((M, F), lambda i: (0, 0)),
                      pl.BlockSpec((1, F), lambda i: (0, 0))],
            out_specs=pl.BlockSpec((M, F), lambda i: (0, 0)),
        ),
        compiler_params=pltpu.CompilerParams(
            dimension_semantics=("arbitrary",),
            vmem_limit_bytes=budget,
        ),
        cost_estimate=pl.CostEstimate(
            flops=flops, transcendentals=0, bytes_accessed=bytes_accessed),
    )(A_pad, h0, bias2d)


# --------------------------------------------------------------------------
# Forward
# --------------------------------------------------------------------------
def _sgc_gen_forward_impl(x, edge_index, weight, bias, hops):
    """SGC_gen.forward(x, edge_index).

    x:          [N, in_channels]  float32
    edge_index: [2, E]            int32   (row 0 = source, row 1 = target)
    weight:     [out_channels, in_channels]  (torch Linear convention)
    bias:       [out_channels]
    """
    N, Fin = x.shape
    Fout = weight.shape[0]

    N_pad = _round_up(N, LANE)
    Fin_pad = _round_up(Fin, LANE)
    Fout_pad = _round_up(Fout, LANE)

    budget = _vmem_budget()

    # ---- glue: padded symmetric-normalized adjacency built in-place ----
    # TODO(synk): PyG add_remaining_self_loops keeps an existing self-loop at
    # weight 1, whereas `A + I` adds on top of it; inputs here have no
    # self-loops so the two agree.
    src, dst = edge_index[0], edge_index[1]
    A = jnp.zeros((N_pad, N_pad), jnp.float32).at[dst, src].add(1.0)
    diag = jnp.arange(N, dtype=jnp.int32)
    A = A.at[diag, diag].add(1.0)
    deg = A.sum(axis=1)
    dinv = jnp.where(deg > 0.0, lax.rsqrt(jnp.maximum(deg, 1e-12)), 0.0)
    A_pad = (dinv[:, None] * A * dinv[None, :]).astype(jnp.bfloat16)

    # ---- lane/sublane padding to 128 multiples; bf16 operands ----
    x_pad = jnp.zeros((N_pad, Fin_pad), jnp.bfloat16).at[:N, :Fin].set(
        x.astype(jnp.bfloat16))
    wT_pad = jnp.zeros((Fin_pad, Fout_pad), jnp.bfloat16).at[:Fin, :Fout].set(
        weight.T.astype(jnp.bfloat16))
    b_pad = jnp.zeros((1, Fout_pad), jnp.float32).at[0, :Fout].set(
        bias.astype(jnp.float32))

    # ---- project FIRST: h0 = x @ W^T (shrinks all K propagations to Fout) ----
    h = _tiled_matmul(
        x_pad, wT_pad, b_pad,
        add_bias=(hops == 0),
        out_dtype=(jnp.float32 if hops == 0 else jnp.bfloat16),
        budget=budget)

    if hops > 0:
        if _fused_hops_feasible(N_pad, Fout_pad, budget):
            # A_hat resident in VMEM for all K hops: one kernel, one A read.
            h = _fused_hops(A_pad, h, b_pad, hops, budget)
        else:
            # Large-graph fallback: per-hop tiled matmuls with resident h.
            for t in range(hops):
                last = (t == hops - 1)
                h = _tiled_matmul(
                    A_pad, h, b_pad if last else None,
                    add_bias=last,
                    out_dtype=(jnp.float32 if last else jnp.bfloat16),
                    budget=budget)

    return h[:N, :Fout].astype(x.dtype)


sgc_gen_forward = jax.jit(_sgc_gen_forward_impl, static_argnames="hops")


def reference_forward(x, edge_index, weight, bias, hops):
    """Pure-JAX f32 reference for correctness checking."""
    N = x.shape[0]
    A = jnp.zeros((N, N), jnp.float32).at[edge_index[1], edge_index[0]].add(1.0)
    A = A + jnp.eye(N, dtype=jnp.float32)
    deg = A.sum(axis=1)
    dinv = jnp.where(deg > 0.0, 1.0 / jnp.sqrt(deg), 0.0)
    A_hat = dinv[:, None] * A * dinv[None, :]
    h = x @ weight.T
    for _ in range(hops):
        h = A_hat @ h
    return h + bias[None, :]


if __name__ == "__main__":
    key = jax.random.PRNGKey(0)
    k_x, k_src, k_off, k_w, k_b = jax.random.split(key, 5)

    # Small graph: 16 nodes, 8 input features, 4 output features, 2 hops.
    N, Fin, Fout, hops, E = 16, 8, 4, 2, 48

    x = jax.random.normal(k_x, (N, Fin), dtype=jnp.float32)

    # Random edges without self-loops (src != dst) so gcn_norm self-loop
    # handling matches exactly.
    src = jax.random.randint(k_src, (E,), 0, N, dtype=jnp.int32)
    off = jax.random.randint(k_off, (E,), 1, N, dtype=jnp.int32)
    dst = (src + off) % N
    edge_index = jnp.stack([src, dst], axis=0)

    # Deterministic parameter init (glorot-ish for weight, zeros for bias).
    limit = (6.0 / (Fin + Fout)) ** 0.5
    weight = jax.random.uniform(k_w, (Fout, Fin), jnp.float32, -limit, limit)
    bias = jnp.zeros((Fout,), jnp.float32)

    out = sgc_gen_forward(x, edge_index, weight, bias, hops)
    out = jax.block_until_ready(out)

    ref = reference_forward(x, edge_index, weight, bias, hops)
    assert out.shape == (N, Fout)
    # bf16 operands (f32 accumulation) -> relaxed tolerance vs f32 reference.
    assert jnp.allclose(out, ref, atol=5e-2, rtol=5e-2), "mismatch vs reference"

    print("KERNEL_OK")
</pallas_src>

<mosaic_0001>
module attributes {stable_mosaic.version = 11 : i64} {
  func.func private @main(%arg0: i32) attributes {dimension_semantics = [#tpu.dimension_semantics<core_parallel>], iteration_bounds = array<i64: 2>, tpu.core_type = #tpu.core_type<sc_scalar_subcore>, window_params = []} {
    return
  }
}

module attributes {stable_mosaic.version = 11 : i64} {
  func.func private @main(%arg0: i32) attributes {dimension_semantics = [#tpu.dimension_semantics<core_parallel>], iteration_bounds = array<i64: 2>, tpu.core_type = #tpu.core_type<sc_scalar_subcore>, window_params = []} {
    return
  }
}

module attributes {stable_mosaic.version = 11 : i64} {
  func.func @_mm_kernel(%arg0: i32, %arg1: i32, %arg2: memref<128x128xbf16, #tpu.memory_space<vmem>>, %arg3: memref<128x128xbf16, #tpu.memory_space<vmem>>, %arg4: memref<128x128xbf16, #tpu.memory_space<vmem>>, %arg5: memref<128x128xf32, #tpu.memory_space<vmem>>) attributes {dimension_semantics = [#tpu.dimension_semantics<parallel>, #tpu.dimension_semantics<arbitrary>], iteration_bounds = array<i64: 1, 1>, scalar_prefetch = 0 : i64, scratch_operands = 1 : i64, tpu.core_type = #tpu.core_type<tc>, window_params = [{transform_indices = @transform_0, window_bounds = array<i64: 128, 128>}, {pipeline_mode = #tpu.pipeline_mode<synchronous>, transform_indices = @transform_1, window_bounds = array<i64: 128, 128>}, {transform_indices = @transform_2, window_bounds = array<i64: 128, 128>}]} {
    %c0_i32 = arith.constant 0 : i32
    %0 = arith.cmpi eq, %arg1, %c0_i32 : i32
    %1 = arith.extui %0 : i1 to i32
    %c0_i32_0 = arith.constant 0 : i32
    %2 = arith.cmpi ne, %1, %c0_i32_0 : i32
    scf.if %2 {
      %cst_9 = arith.constant 0.000000e+00 : f32
      %15 = vector.broadcast %cst_9 : f32 to vector<128x128xf32>
      %c0_10 = arith.constant 0 : index
      %c0_11 = arith.constant 0 : index
      %16 = vector.load %arg5[%c0_10, %c0_11] : memref<128x128xf32, #tpu.memory_space<vmem>>, vector<128x128xf32>
      tpu.vector_store %arg5[%c0_10, %c0_11], %15 {strides = array<i32>} : memref<128x128xf32, #tpu.memory_space<vmem>>, vector<128x128xf32>,
    } else {
    }
    %c128_i32 = arith.constant 128 : i32
    %3 = arith.muli %arg1, %c128_i32 : i32
    %4 = tpu.assume_multiple %3, 128 : i32
    %5 = arith.index_cast %4 : i32 to index
    %c0 = arith.constant 0 : index
    %6 = vector.load %arg3[%5, %c0] : memref<128x128xbf16, #tpu.memory_space<vmem>>, vector<128x128xbf16>
    %c0_1 = arith.constant 0 : index
    %c0_2 = arith.constant 0 : index
    %7 = vector.load %arg5[%c0_1, %c0_2] : memref<128x128xf32, #tpu.memory_space<vmem>>, vector<128x128xf32>
    %c0_3 = arith.constant 0 : index
    %c0_4 = arith.constant 0 : index
    %8 = vector.load %arg2[%c0_3, %c0_4] : memref<128x128xbf16, #tpu.memory_space<vmem>>, vector<128x128xbf16>
    %cst = arith.constant dense<0.000000e+00> : vector<128x128xf32>
    %9 = tpu.matmul %8, %6, %cst {dimension_numbers = #tpu.dot_dimension_numbers<[1], [0], [0], [1], [0, 0, 1, 1], [], []>} : vector<128x128xbf16>, vector<128x128xbf16>, vector<128x128xf32> -> vector<128x128xf32>
    %10 = arith.addf %7, %9 : vector<128x128xf32>
    %c0_5 = arith.constant 0 : index
    %c0_6 = arith.constant 0 : index
    %11 = vector.load %arg5[%c0_5, %c0_6] : memref<128x128xf32, #tpu.memory_space<vmem>>, vector<128x128xf32>
    tpu.vector_store %arg5[%c0_5, %c0_6], %10 {strides = array<i32>} : memref<128x128xf32, #tpu.memory_space<vmem>>, vector<128x128xf32>,
    %c0_i32_7 = arith.constant 0 : i32
    %12 = arith.cmpi eq, %arg1, %c0_i32_7 : i32
    %13 = arith.extui %12 : i1 to i32
    %c0_i32_8 = arith.constant 0 : i32
    %14 = arith.cmpi ne, %13, %c0_i32_8 : i32
    scf.if %14 {
      %c0_9 = arith.constant 0 : index
      %c0_10 = arith.constant 0 : index
      %15 = vector.load %arg5[%c0_9, %c0_10] : memref<128x128xf32, #tpu.memory_space<vmem>>, vector<128x128xf32>
      %16 = arith.truncf %15 : vector<128x128xf32> to vector<128x128xbf16>
      %c0_11 = arith.constant 0 : index
      %c0_12 = arith.constant 0 : index
      %17 = vector.load %arg4[%c0_11, %c0_12] : memref<128x128xbf16, #tpu.memory_space<vmem>>, vector<128x128xbf16>
      tpu.vector_store %arg4[%c0_11, %c0_12], %16 {strides = array<i32>} : memref<128x128xbf16, #tpu.memory_space<vmem>>, vector<128x128xbf16>,
    } else {
    }
    return
  }
  func.func @transform_0(%arg0: i32, %arg1: i32) -> (i32, i32) {
    %c0_i32 = arith.constant 0 : i32
    return %arg0, %arg1 : i32, i32
  }
  func.func @transform_1(%arg0: i32, %arg1: i32) -> (i32, i32) {
    %c0_i32 = arith.constant 0 : i32
    %c0_i32_0 = arith.constant 0 : i32
    %c0_i32_1 = arith.constant 0 : i32
    return %c0_i32, %c0_i32_0 : i32, i32
  }
  func.func @transform_2(%arg0: i32, %arg1: i32) -> (i32, i32) {
    %c0_i32 = arith.constant 0 : i32
    %c0_i32_0 = arith.constant 0 : i32
    return %arg0, %c0_i32 : i32, i32
  }
}

module attributes {stable_mosaic.version = 11 : i64} {
  func.func @_fused_hops_kernel(%arg0: i32, %arg1: memref<128x128xbf16, #tpu.memory_space<vmem>>, %arg2: memref<128x128xbf16, #tpu.memory_space<vmem>>, %arg3: memref<1x128xf32, #tpu.memory_space<vmem>>, %arg4: memref<128x128xf32, #tpu.memory_space<vmem>>) attributes {dimension_semantics = [#tpu.dimension_semantics<arbitrary>], iteration_bounds = array<i64: 1>, scalar_prefetch = 0 : i64, scratch_operands = 0 : i64, tpu.core_type = #tpu.core_type<tc>, window_params = [{pipeline_mode = #tpu.pipeline_mode<synchronous>, transform_indices = @transform_0, window_bounds = array<i64: 128, 128>}, {pipeline_mode = #tpu.pipeline_mode<synchronous>, transform_indices = @transform_1, window_bounds = array<i64: 128, 128>}, {pipeline_mode = #tpu.pipeline_mode<synchronous>, transform_indices = @transform_2, window_bounds = array<i64: 1, 128>}, {pipeline_mode = #tpu.pipeline_mode<synchronous>, transform_indices = @transform_3, window_bounds = array<i64: 128, 128>}]} {
    %c0 = arith.constant 0 : index
    %c0_0 = arith.constant 0 : index
    %0 = vector.load %arg2[%c0, %c0_0] : memref<128x128xbf16, #tpu.memory_space<vmem>>, vector<128x128xbf16>
    %1 = arith.extf %0 : vector<128x128xbf16> to vector<128x128xf32>
    %c0_1 = arith.constant 0 : index
    %c0_2 = arith.constant 0 : index
    %2 = vector.load %arg1[%c0_1, %c0_2] : memref<128x128xbf16, #tpu.memory_space<vmem>>, vector<128x128xbf16>
    %3 = arith.truncf %1 : vector<128x128xf32> to vector<128x128xbf16>
    %cst = arith.constant dense<0.000000e+00> : vector<128x128xf32>
    %4 = tpu.matmul %2, %3, %cst {dimension_numbers = #tpu.dot_dimension_numbers<[1], [0], [0], [1], [0, 0, 1, 1], [], []>} : vector<128x128xbf16>, vector<128x128xbf16>, vector<128x128xf32> -> vector<128x128xf32>
    %c0_3 = arith.constant 0 : index
    %c0_4 = arith.constant 0 : index
    %5 = vector.load %arg1[%c0_3, %c0_4] : memref<128x128xbf16, #tpu.memory_space<vmem>>, vector<128x128xbf16>
    %6 = arith.truncf %4 : vector<128x128xf32> to vector<128x128xbf16>
    %cst_5 = arith.constant dense<0.000000e+00> : vector<128x128xf32>
    %7 = tpu.matmul %5, %6, %cst_5 {dimension_numbers = #tpu.dot_dimension_numbers<[1], [0], [0], [1], [0, 0, 1, 1], [], []>} : vector<128x128xbf16>, vector<128x128xbf16>, vector<128x128xf32> -> vector<128x128xf32>
    %c0_6 = arith.constant 0 : index
    %c0_7 = arith.constant 0 : index
    %8 = vector.load %arg3[%c0_6, %c0_7] : memref<1x128xf32, #tpu.memory_space<vmem>>, vector<1x128xf32>
    %9 = vector.broadcast %8 : vector<1x128xf32> to vector<128x128xf32>
    %10 = arith.addf %7, %9 : vector<128x128xf32>
    %c0_8 = arith.constant 0 : index
    %c0_9 = arith.constant 0 : index
    %11 = vector.load %arg4[%c0_8, %c0_9] : memref<128x128xf32, #tpu.memory_space<vmem>>, vector<128x128xf32>
    tpu.vector_store %arg4[%c0_8, %c0_9], %10 {strides = array<i32>} : memref<128x128xf32, #tpu.memory_space<vmem>>, vector<128x128xf32>,
    return
  }
  func.func @transform_0(%arg0: i32) -> (i32, i32) {
    %c0_i32 = arith.constant 0 : i32
    %c0_i32_0 = arith.constant 0 : i32
    %c0_i32_1 = arith.constant 0 : i32
    return %c0_i32, %c0_i32_0 : i32, i32
  }
  func.func @transform_1(%arg0: i32) -> (i32, i32) {
    %c0_i32 = arith.constant 0 : i32
    %c0_i32_0 = arith.constant 0 : i32
    %c0_i32_1 = arith.constant 0 : i32
    return %c0_i32, %c0_i32_0 : i32, i32
  }
  func.func @transform_2(%arg0: i32) -> (i32, i32) {
    %c0_i32 = arith.constant 0 : i32
    %c0_i32_0 = arith.constant 0 : i32
    %c0_i32_1 = arith.constant 0 : i32
    return %c0_i32, %c0_i32_0 : i32, i32
  }
  func.func @transform_3(%arg0: i32) -> (i32, i32) {
    %c0_i32 = arith.constant 0 : i32
    %c0_i32_0 = arith.constant 0 : i32
    %c0_i32_1 = arith.constant 0 : i32
    return %c0_i32, %c0_i32_0 : i32, i32
  }
}

</mosaic_0001>

<bundles_post_ra>
// kernel: _sgc_gen_forward_impl.3
= control target key start
LH: loop header
LB: loop body
LE: loop exit
PB: predicated region body
PF: predicated region fallthrough
CT: control target
= control target key end

     0   :  { %s620_s1 = inlined_call_operand.vmem [shape: bf16[128,128], index: 1, kind: input, shape index: {}]   ;;  %s621_s0 = inlined_call_operand.vmem [shape: bf16[128,128], index: 0, kind: input, shape index: {}]   ;;  %s622_s2 = inlined_call_operand.vmem [shape: f32[1,128], index: 2, kind: input, shape index: {}]   ;;  %s623_s3 = inlined_call_operand.vmem [shape: f32[128,128], index: 3, kind: output, shape index: {}]  }
   0x1   :  { %v485_v0 = vld [vmem:[%s620_s1] sm:$0xff]   ;;  %v486_v1 = vld [vmem:[%s620_s1 + $0x8] sm:$0xff]   ;;  %v487_v2 = vld [vmem:[%s620_s1 + $0x10] sm:$0xff]  }
   0x2   :  { %421 = vmatprep.subr.bf16.mxu0 %v485_v0  ;;  %v488_v3 = vld [vmem:[%s620_s1 + $0x18] sm:$0xff]   ;;  %v493_v4 = vld [vmem:[%s621_s0] sm:$0xff]   ;;  %v490_v6 = vld [vmem:[%s620_s1 + $0x28] sm:$0xff]  }
   0x3   :  { %422 = vmatpush3.bf16.msra.mxu0 %v485_v0  ;;  %437 = vmatprep.mubr.bf16.mxu0 %v493_v4  ;;  %v489_v5 = vld [vmem:[%s620_s1 + $0x20] sm:$0xff]   ;;  %v491_v7 = vld [vmem:[%s620_s1 + $0x30] sm:$0xff]   ;;  %v492_v8 = vld [vmem:[%s620_s1 + $0x38] sm:$0xff]  }
   0x4   :  { %423 = vmatprep.subr.bf16.mxu0 %v486_v1  ;;  %469 = vmatprep.mubr.bf16.mxu1 %v493_v4  ;;  %v494_v9 = vld [vmem:[%s621_s0 + $0x8] sm:$0xff]   ;;  %v495_v10 = vld [vmem:[%s621_s0 + $0x10] sm:$0xff]   ;;  %v496_v11 = vld [vmem:[%s621_s0 + $0x18] sm:$0xff]  }
   0x5   :  { %v497_v12 = vld [vmem:[%s621_s0 + $0x20] sm:$0xff]   ;;  %v498_v13 = vld [vmem:[%s621_s0 + $0x28] sm:$0xff]   ;;  %v499_v14 = vld [vmem:[%s621_s0 + $0x30] sm:$0xff]  }
   0x6   :  { %v500_v15 = vld [vmem:[%s621_s0 + $0x38] sm:$0xff]   ;;  %v388_v40 = vld [vmem:[%s622_s2] ss:$0 sm:$0xff] }
   0x7   :  { %424 = vmatpush3.bf16.msra.mxu0 %v486_v1 }
   0x8   :  { %425 = vmatprep.subr.bf16.mxu0 %v487_v2 }
   0xb   :  { %426 = vmatpush3.bf16.msra.mxu0 %v487_v2 }
   0xc   :  { %427 = vmatprep.subr.bf16.mxu0 %v488_v3 }
   0xf   :  { %428 = vmatpush3.bf16.msra.mxu0 %v488_v3 }
  0x10   :  { %429 = vmatprep.subr.bf16.mxu0 %v489_v5 }
  0x13   :  { %430 = vmatpush3.bf16.msra.mxu0 %v489_v5 }
  0x14   :  { %431 = vmatprep.subr.bf16.mxu0 %v490_v6 }
  0x17   :  { %432 = vmatpush3.bf16.msra.mxu0 %v490_v6 }
  0x18   :  { %433 = vmatprep.subr.bf16.mxu0 %v491_v7 }
  0x1b   :  { %434 = vmatpush3.bf16.msra.mxu0 %v491_v7 }
  0x1c   :  { %435 = vmatprep.subr.bf16.mxu0 %v492_v8 }
  0x1f   :  { %436 = vmatpush3.bf16.msra.mxu0 %v492_v8 }
  0x22   :  { %438 = vmatmul.mubr.bf16.vlgmr.msra.gmra.mrb[0].mxu0 %v494_v9 }
  0x23   :  { %441 = vmatprep.mubr.bf16.mxu0 %v495_v10 }
  0x2a   :  { %442 = vmatmul.mubr.bf16.gmra.mrb[4].mxu0 %v496_v11 }
  0x2b   :  { %445 = vmatprep.mubr.bf16.mxu0 %v497_v12 }
  0x32   :  { %446 = vmatmul.mubr.bf16.gmra.mrb[8].mxu0 %v498_v13 }
  0x33   :  { %449 = vmatprep.mubr.bf16.mxu0 %v499_v14 }
  0x3a   :  { %450 = vmatmul.mubr.bf16.gmra.mrb[12].mxu0 %v500_v15 }
  0xf5   :  { %v439_v16 = vpop.f32.mrb[0].mxu0 }
  0xf6   :  { %v177_v17 = vpop.f32.mrb[1].mxu0 }
  0xf7   :  { %v440_v18 = vpop.f32.mrb[2].mxu0 }
  0xf8   :  { %v241_v19 = vpack.c.bf16 %v440_v18, %v439_v16  ;;  %v180_v20 = vpop.f32.mrb[3].mxu0 }
  0xf9   :  { %v240_v21 = vpack.c.bf16 %v180_v20, %v177_v17 }
  0xfb   :  { %453 = vmatprep.subr.bf16.mxu1 %v240_v21 }
  0xfc   :  { %454 = vmatpush3.bf16.msra.mxu1 %v240_v21 }
  0xfd   :  { %v443_v22 = vpop.f32.mrb[4].mxu0  ;;  %455 = vmatprep.subr.bf16.mxu1 %v241_v19 }
  0xfe   :  { %v193_v23 = vpop.f32.mrb[5].mxu0 }
  0xff   :  { %v444_v24 = vpop.f32.mrb[6].mxu0 }
 0x100   :  { %v243_v25 = vpack.c.bf16 %v444_v24, %v443_v22  ;;  %v196_v26 = vpop.f32.mrb[7].mxu0  ;;  %456 = vmatpush3.bf16.msra.mxu1 %v241_v19 }
 0x101   :  { %v242_v27 = vpack.c.bf16 %v196_v26, %v193_v23 }
 0x103   :  { %457 = vmatprep.subr.bf16.mxu1 %v242_v27 }
 0x104   :  { %458 = vmatpush3.bf16.msra.mxu1 %v242_v27 }
 0x105   :  { %v447_v28 = vpop.f32.mrb[8].mxu0  ;;  %459 = vmatprep.subr.bf16.mxu1 %v243_v25 }
 0x106   :  { %v209_v29 = vpop.f32.mrb[9].mxu0 }
 0x107   :  { %v448_v30 = vpop.f32.mrb[10].mxu0 }
 0x108   :  { %v245_v31 = vpack.c.bf16 %v448_v30, %v447_v28  ;;  %v212_v32 = vpop.f32.mrb[11].mxu0  ;;  %460 = vmatpush3.bf16.msra.mxu1 %v243_v25 }
 0x109   :  { %v244_v33 = vpack.c.bf16 %v212_v32, %v209_v29 }
 0x10b   :  { %461 = vmatprep.subr.bf16.mxu1 %v244_v33 }
 0x10c   :  { %462 = vmatpush3.bf16.msra.mxu1 %v244_v33 }
 0x10d   :  { %v451_v34 = vpop.f32.mrb[12].mxu0  ;;  %463 = vmatprep.subr.bf16.mxu1 %v245_v31 }
 0x10e   :  { %v225_v35 = vpop.f32.mrb[13].mxu0 }
 0x10f   :  { %v452_v36 = vpop.f32.mrb[14].mxu0 }
 0x110   :  { %v247_v37 = vpack.c.bf16 %v452_v36, %v451_v34  ;;  %v228_v38 = vpop.f32.mrb[15].mxu0  ;;  %464 = vmatpush3.bf16.msra.mxu1 %v245_v31 }
 0x111   :  { %v246_v39 = vpack.c.bf16 %v228_v38, %v225_v35 }
 0x113   :  { %465 = vmatprep.subr.bf16.mxu1 %v246_v39 }
 0x114   :  { %466 = vmatpush3.bf16.msra.mxu1 %v246_v39 }
 0x115   :  { %467 = vmatprep.subr.bf16.mxu1 %v247_v37 }
 0x118   :  { %468 = vmatpush3.bf16.msra.mxu1 %v247_v37 }
 0x11b   :  { %470 = vmatmul.mubr.bf16.vlgmr.msra.gmra.mrb[0].mxu1 %v494_v9 }
 0x11c   :  { %473 = vmatprep.mubr.bf16.mxu1 %v495_v10 }
 0x123   :  { %474 = vmatmul.mubr.bf16.gmra.mrb[4].mxu1 %v496_v11 }
 0x124   :  { %477 = vmatprep.mubr.bf16.mxu1 %v497_v12 }
 0x12b   :  { %478 = vmatmul.mubr.bf16.gmra.mrb[8].mxu1 %v498_v13 }
 0x12c   :  { %481 = vmatprep.mubr.bf16.mxu1 %v499_v14 }
 0x133   :  { %482 = vmatmul.mubr.bf16.gmra.mrb[12].mxu1 %v500_v15 }
 0x1ee   :  { %v471_v41 = vpop.f32.mrb[0].mxu1 }
 0x1ef   :  { %v298_v42 = vadd.f32 %v471_v41, %v388_v40  ;;  %v289_v43 = vpop.f32.mrb[1].mxu1 }
 0x1f0   :  { %v290_v44 = vadd.f32 %v388_v40, %v289_v43  ;;  %v472_v45 = vpop.f32.mrb[2].mxu1 }
 0x1f1   :  { %354 = vst [vmem:[%s623_s3 + $0x10] sm:$0xff] %v298_v42  ;;  %v301_v46 = vadd.f32 %v472_v45, %v388_v40  ;;  %v292_v47 = vpop.f32.mrb[3].mxu1 }
 0x1f2   :  { %352 = vst [vmem:[%s623_s3] sm:$0xff] %v290_v44  ;;  %v293_v48 = vadd.f32 %v388_v40, %v292_v47 }
 0x1f3   :  { %355 = vst [vmem:[%s623_s3 + $0x18] sm:$0xff] %v301_v46 }
 0x1f4   :  { %353 = vst [vmem:[%s623_s3 + $0x8] sm:$0xff] %v293_v48 }
 0x1f6   :  { %v475_v49 = vpop.f32.mrb[4].mxu1 }
 0x1f7   :  { %v314_v50 = vadd.f32 %v475_v49, %v388_v40  ;;  %v305_v51 = vpop.f32.mrb[5].mxu1 }
 0x1f8   :  { %v306_v52 = vadd.f32 %v388_v40, %v305_v51  ;;  %v476_v53 = vpop.f32.mrb[6].mxu1 }
 0x1f9   :  { %358 = vst [vmem:[%s623_s3 + $0x30] sm:$0xff] %v314_v50  ;;  %v317_v54 = vadd.f32 %v476_v53, %v388_v40  ;;  %v308_v55 = vpop.f32.mrb[7].mxu1 }
 0x1fa   :  { %356 = vst [vmem:[%s623_s3 + $0x20] sm:$0xff] %v306_v52  ;;  %v309_v56 = vadd.f32 %v388_v40, %v308_v55 }
 0x1fb   :  { %359 = vst [vmem:[%s623_s3 + $0x38] sm:$0xff] %v317_v54 }
 0x1fc   :  { %357 = vst [vmem:[%s623_s3 + $0x28] sm:$0xff] %v309_v56 }
 0x1fe   :  { %v479_v57 = vpop.f32.mrb[8].mxu1 }
 0x1ff   :  { %v330_v58 = vadd.f32 %v479_v57, %v388_v40  ;;  %v321_v59 = vpop.f32.mrb[9].mxu1 }
 0x200   :  { %v322_v60 = vadd.f32 %v388_v40, %v321_v59  ;;  %v480_v61 = vpop.f32.mrb[10].mxu1 }
 0x201   :  { %362 = vst [vmem:[%s623_s3 + $0x50] sm:$0xff] %v330_v58  ;;  %v333_v62 = vadd.f32 %v480_v61, %v388_v40  ;;  %v324_v63 = vpop.f32.mrb[11].mxu1 }
 0x202   :  { %360 = vst [vmem:[%s623_s3 + $0x40] sm:$0xff] %v322_v60  ;;  %v325_v0 = vadd.f32 %v388_v40, %v324_v63 }
 0x203   :  { %363 = vst [vmem:[%s623_s3 + $0x58] sm:$0xff] %v333_v62 }
 0x204   :  { %361 = vst [vmem:[%s623_s3 + $0x48] sm:$0xff] %v325_v0 }
 0x206   :  { %v483_v1 = vpop.f32.mrb[12].mxu1 }
 0x207   :  { %v346_v2 = vadd.f32 %v483_v1, %v388_v40  ;;  %v337_v3 = vpop.f32.mrb[13].mxu1 }
 0x208   :  { %v338_v4 = vadd.f32 %v388_v40, %v337_v3  ;;  %v484_v5 = vpop.f32.mrb[14].mxu1 }
 0x209   :  { %366 = vst [vmem:[%s623_s3 + $0x70] sm:$0xff] %v346_v2  ;;  %v349_v6 = vadd.f32 %v484_v5, %v388_v40  ;;  %v340_v7 = vpop.f32.mrb[15].mxu1 }
 0x20a   :  { %364 = vst [vmem:[%s623_s3 + $0x60] sm:$0xff] %v338_v4  ;;  %v341_v8 = vadd.f32 %v388_v40, %v340_v7 }
 0x20b   :  { %367 = vst [vmem:[%s623_s3 + $0x78] sm:$0xff] %v349_v6 }
 0x20c   :  { %365 = vst [vmem:[%s623_s3 + $0x68] sm:$0xff] %v341_v8 }

// kernel: _sgc_gen_forward_impl.2
= control target key start
LH: loop header
LB: loop body
LE: loop exit
PB: predicated region body
PF: predicated region fallthrough
CT: control target
= control target key end

     0   :  { %s677_s1 = inlined_call_operand.vmem [shape: bf16[128,128], index: 1, kind: input, shape index: {}]   ;;  %s678_s0 = inlined_call_operand.vmem [shape: bf16[128,128], index: 0, kind: input, shape index: {}]   ;;  %s679_s2 = inlined_call_operand.vmem [shape: bf16[128,128], index: 2, kind: output, shape index: {}]  }
   0x1   :  { %v574_v0 = vld [vmem:[%s677_s1] sm:$0xff]   ;;  %v575_v1 = vld [vmem:[%s677_s1 + $0x8] sm:$0xff]   ;;  %v576_v2 = vld [vmem:[%s677_s1 + $0x10] sm:$0xff]  }
   0x2   :  { %526 = vmatprep.subr.bf16.mxu0 %v574_v0  ;;  %558 = vmatprep.subr.bf16.mxu1 %v574_v0  ;;  %v577_v3 = vld [vmem:[%s677_s1 + $0x18] sm:$0xff]   ;;  %v582_v4 = vld [vmem:[%s678_s0] sm:$0xff]   ;;  %v579_v7 = vld [vmem:[%s677_s1 + $0x28] sm:$0xff]  }
   0x3   :  { %527 = vmatpush3.bf16.msra.mxu0 %v574_v0  ;;  %566 = vmatpush3.bf16.msra.mxu1 %v574_v0  ;;  %v583_v5 = vld [vmem:[%s678_s0 + $0x20] sm:$0xff]   ;;  %v580_v8 = vld [vmem:[%s677_s1 + $0x30] sm:$0xff]   ;;  %v581_v9 = vld [vmem:[%s677_s1 + $0x38] sm:$0xff]  }
   0x4   :  { %528 = vmatprep.subr.bf16.mxu0 %v575_v1  ;;  %559 = vmatprep.subr.bf16.mxu1 %v575_v1  ;;  %v578_v6 = vld [vmem:[%s677_s1 + $0x20] sm:$0xff]   ;;  %v584_v10 = vld [vmem:[%s678_s0 + $0x8] sm:$0xff]   ;;  %v586_v12 = vld [vmem:[%s678_s0 + $0x10] sm:$0xff]  }
   0x5   :  { %542 = vmatprep.mubr.bf16.mxu0 %v582_v4  ;;  %550 = vmatprep.mubr.bf16.mxu1 %v583_v5  ;;  %v585_v11 = vld [vmem:[%s678_s0 + $0x28] sm:$0xff]   ;;  %v587_v13 = vld [vmem:[%s678_s0 + $0x30] sm:$0xff]   ;;  %v588_v14 = vld [vmem:[%s678_s0 + $0x18] sm:$0xff]  }
   0x6   :  { %v589_v15 = vld [vmem:[%s678_s0 + $0x38] sm:$0xff]  }
   0x7   :  { %529 = vmatpush3.bf16.msra.mxu0 %v575_v1  ;;  %567 = vmatpush3.bf16.msra.mxu1 %v575_v1 }
   0x8   :  { %530 = vmatprep.subr.bf16.mxu0 %v576_v2  ;;  %560 = vmatprep.subr.bf16.mxu1 %v576_v2 }
   0xb   :  { %531 = vmatpush3.bf16.msra.mxu0 %v576_v2  ;;  %568 = vmatpush3.bf16.msra.mxu1 %v576_v2 }
   0xc   :  { %532 = vmatprep.subr.bf16.mxu0 %v577_v3  ;;  %561 = vmatprep.subr.bf16.mxu1 %v577_v3 }
   0xf   :  { %533 = vmatpush3.bf16.msra.mxu0 %v577_v3  ;;  %569 = vmatpush3.bf16.msra.mxu1 %v577_v3 }
  0x10   :  { %534 = vmatprep.subr.bf16.mxu0 %v578_v6  ;;  %562 = vmatprep.subr.bf16.mxu1 %v578_v6 }
  0x13   :  { %535 = vmatpush3.bf16.msra.mxu0 %v578_v6  ;;  %570 = vmatpush3.bf16.msra.mxu1 %v578_v6 }
  0x14   :  { %536 = vmatprep.subr.bf16.mxu0 %v579_v7  ;;  %563 = vmatprep.subr.bf16.mxu1 %v579_v7 }
  0x17   :  { %537 = vmatpush3.bf16.msra.mxu0 %v579_v7  ;;  %571 = vmatpush3.bf16.msra.mxu1 %v579_v7 }
  0x18   :  { %538 = vmatprep.subr.bf16.mxu0 %v580_v8  ;;  %564 = vmatprep.subr.bf16.mxu1 %v580_v8 }
  0x1b   :  { %539 = vmatpush3.bf16.msra.mxu0 %v580_v8  ;;  %572 = vmatpush3.bf16.msra.mxu1 %v580_v8 }
  0x1c   :  { %540 = vmatprep.subr.bf16.mxu0 %v581_v9  ;;  %565 = vmatprep.subr.bf16.mxu1 %v581_v9 }
  0x1f   :  { %541 = vmatpush3.bf16.msra.mxu0 %v581_v9  ;;  %573 = vmatpush3.bf16.msra.mxu1 %v581_v9 }
  0x22   :  { %543 = vmatmul.mubr.bf16.vlgmr.msra.gmra.mrb[0].mxu0 %v584_v10  ;;  %551 = vmatmul.mubr.bf16.vlgmr.msra.gmra.mrb[0].mxu1 %v585_v11 }
  0x23   :  { %546 = vmatprep.mubr.bf16.mxu0 %v586_v12  ;;  %554 = vmatprep.mubr.bf16.mxu1 %v587_v13 }
  0x2a   :  { %547 = vmatmul.mubr.bf16.gmra.mrb[4].mxu0 %v588_v14  ;;  %555 = vmatmul.mubr.bf16.gmra.mrb[4].mxu1 %v589_v15 }
  0xf5   :  { %v544_v16 = vpop.f32.mrb[0].mxu0  ;;  %v552_v17 = vpop.f32.mrb[0].mxu1 }
  0xf6   :  { %v215_v18 = vpop.f32.mrb[1].mxu0  ;;  %v247_v19 = vpop.f32.mrb[1].mxu1 }
  0xf7   :  { %v545_v20 = vpop.f32.mrb[2].mxu0  ;;  %v553_v21 = vpop.f32.mrb[2].mxu1 }
  0xf8   :  { %v471_v22 = vpack.c.bf16 %v545_v20, %v544_v16  ;;  %v491_v23 = vpack.c.bf16 %v553_v21, %v552_v17  ;;  %v218_v24 = vpop.f32.mrb[3].mxu0  ;;  %v250_v25 = vpop.f32.mrb[3].mxu1 }
  0xf9   :  { %v466_v26 = vpack.c.bf16 %v218_v24, %v215_v18  ;;  %v486_v27 = vpack.c.bf16 %v250_v25, %v247_v19 }
  0xfa   :  { %503 = vst [vmem:[%s679_s2 + $0x8] sm:$0xff] %v471_v22   ;;  %507 = vst [vmem:[%s679_s2 + $0x28] sm:$0xff] %v491_v23  }
  0xfb   :  { %467 = vst [vmem:[%s679_s2] sm:$0xff] %v466_v26   ;;  %506 = vst [vmem:[%s679_s2 + $0x20] sm:$0xff] %v486_v27  }
  0xfd   :  { %v548_v28 = vpop.f32.mrb[4].mxu0  ;;  %v556_v29 = vpop.f32.mrb[4].mxu1 }
  0xfe   :  { %v231_v30 = vpop.f32.mrb[5].mxu0  ;;  %v263_v31 = vpop.f32.mrb[5].mxu1 }
  0xff   :  { %v549_v32 = vpop.f32.mrb[6].mxu0  ;;  %v557_v33 = vpop.f32.mrb[6].mxu1 }
 0x100   :  { %v481_v34 = vpack.c.bf16 %v549_v32, %v548_v28  ;;  %v501_v35 = vpack.c.bf16 %v557_v33, %v556_v29  ;;  %v234_v36 = vpop.f32.mrb[7].mxu0  ;;  %v266_v37 = vpop.f32.mrb[7].mxu1 }
 0x101   :  { %v476_v38 = vpack.c.bf16 %v234_v36, %v231_v30  ;;  %v496_v39 = vpack.c.bf16 %v266_v37, %v263_v31 }
 0x102   :  { %505 = vst [vmem:[%s679_s2 + $0x18] sm:$0xff] %v481_v34   ;;  %509 = vst [vmem:[%s679_s2 + $0x38] sm:$0xff] %v501_v35  }
 0x103   :  { %504 = vst [vmem:[%s679_s2 + $0x10] sm:$0xff] %v476_v38   ;;  %508 = vst [vmem:[%s679_s2 + $0x30] sm:$0xff] %v496_v39  }

</bundles_post_ra>
